<compile_context>
chip_gen: v6e
topology: v6e:2x2x1
jax: 0.10.0
libtpu: 0.0.40
codegen_flags: <defaults>
</compile_context>

<pallas_src>
import math

import jax
import jax.numpy as jnp
from jax import lax
from jax.experimental import pallas as pl
from jax.experimental.pallas import tpu as pltpu

# ----------------------------- config ---------------------------------------
BATCH = 2
SEQLEN = 8
HIDDEN = 32
NUM_HEADS = 4
HEAD_DIM = HIDDEN // NUM_HEADS
ROTARY_DIM = HEAD_DIM          # config.rotary_emb_dim defaults to attn_head_size
ROTARY_HALF = ROTARY_DIM // 2
ROTARY_BASE = 10000.0          # config.rotary_emb_base
NEG_INF = -1e30                # additive bias standing in for the bool mask's -inf
ROWS = BATCH * SEQLEN          # batch stacked along sublanes (16 rows)
QK_WIDTH = 2 * HIDDEN          # packed q|k slab width


# ------------------------- fused Pallas kernel --------------------------------
def _fused_attention_kernel(bias_ref, qkv_ref, cos_ref, sin_ref, swap_ref,
                            wt_ref, b_ref, o_ref, oacc_ref):
    """Whole problem in one step (batch stacked along sublanes).

    Ref shapes:
      bias_ref : (R, R)          additive bias: key padding + batch block-diag
      qkv_ref  : (R, 3*hidden)   packed [q | k | v], heads along lanes
      cos_ref  : (R, 2*hidden)   [cos_q * scale | cos_k], per-head tiled
      sin_ref  : (R, 2*hidden)   [sin_q * scale | sin_k], per-head tiled (positive)
      swap_ref : (2*hidden, 2*hidden) signed block-diag half-swap operator
      wt_ref   : (hidden, hidden) Wo weight, pre-transposed, bf16
      b_ref    : (1, hidden)     Wo bias (f32)
      o_ref    : (R, hidden)     output slab
      oacc_ref : (R, hidden)     f32 VMEM scratch for per-head outputs
    """
    x = qkv_ref[...]                              # (R, 3*hidden) f32
    qk = x[:, :QK_WIDTH]                          # (R, 2*hidden)

    # Within-head half swap (per head: [-x2 | x1]) via ONE signed
    # block-diagonal permutation matmul — exact data movement, full width.
    # TODO(synk): at production head widths, replace with pltpu.roll (XLU).
    swapped = jnp.dot(qk, swap_ref[...], preferred_element_type=jnp.float32)

    # Full-width non-interleaved RoPE; 1/sqrt(head_dim) folded into q tables.
    rot = qk * cos_ref[...] + swapped * sin_ref[...]
    rot16 = rot.astype(jnp.bfloat16)              # bf16 matmul operands

    bias = bias_ref[...]                          # (R, R) f32
    dn = (((1,), (1,)), ((), ()))                 # contract dim 1 vs 1 == q @ k^T

    # Static 4-head loop, fully unrolled (tiny).
    for h in range(NUM_HEADS):
        qs = h * HEAD_DIM
        ks = HIDDEN + h * HEAD_DIM
        vs = 2 * HIDDEN + h * HEAD_DIM

        qh = rot16[:, qs:qs + HEAD_DIM]                       # (R, Dh) bf16, pre-scaled
        kh = rot16[:, ks:ks + HEAD_DIM]                       # (R, Dh) bf16
        vh = x[:, vs:vs + HEAD_DIM].astype(jnp.bfloat16)      # (R, Dh) bf16

        s = lax.dot_general(qh, kh, dn, preferred_element_type=jnp.float32)
        s = s + bias                                          # f32 masking (-1e30)

        m = jnp.max(s, axis=-1, keepdims=True)
        p = jnp.exp(s - m)
        l = jnp.sum(p, axis=-1, keepdims=True)

        o = jnp.dot(p.astype(jnp.bfloat16), vh,
                    preferred_element_type=jnp.float32)       # (R, Dh) f32
        # Exact normalization (eval parity with PyTorch softmax).
        oacc_ref[:, qs:qs + HEAD_DIM] = o / l

    # One fused Wo projection over the lane-packed head outputs.
    o_all = oacc_ref[...].astype(jnp.bfloat16)                # (R, hidden)
    y = jnp.dot(o_all, wt_ref[...], preferred_element_type=jnp.float32) + b_ref[...]
    o_ref[...] = y.astype(o_ref.dtype)


# ---------------------------- wrapper ----------------------------------------
@jax.jit
def flexbert_padded_rope_parallel_attention(qkv, attn_mask, wo_w, wo_b):
    """qkv: (B, S, 3*hidden) f32 ; attn_mask: (B, S) (1 = keep, 0 = pad).

    Returns (B, S, hidden).
    """
    bs, seqlen, three_hidden = qkv.shape
    rows = bs * seqlen
    scale = 1.0 / math.sqrt(HEAD_DIM)

    # Rotary tables, pre-tiled to the full (rows, 2*hidden) q|k slab width.
    inv_freq = 1.0 / (ROTARY_BASE ** (
        jnp.arange(0, ROTARY_DIM, 2, dtype=jnp.float32) / ROTARY_DIM))
    pos = jnp.arange(seqlen, dtype=jnp.float32)
    freqs = jnp.outer(pos, inv_freq)                          # (S, half)
    cos = jnp.cos(freqs)
    sin = jnp.sin(freqs)
    cos_head = jnp.concatenate([cos, cos], axis=-1)           # (S, Dh)
    sin_head = jnp.concatenate([sin, sin], axis=-1)           # (S, Dh), positive
    cos_hid = jnp.tile(cos_head, (1, NUM_HEADS))              # (S, hidden)
    sin_hid = jnp.tile(sin_head, (1, NUM_HEADS))
    # q-side tables carry the 1/sqrt(head_dim) scale; batch-tile along rows.
    cos_qk = jnp.tile(jnp.concatenate([cos_hid * scale, cos_hid], -1), (bs, 1))
    sin_qk = jnp.tile(jnp.concatenate([sin_hid * scale, sin_hid], -1), (bs, 1))

    # Signed block-diagonal half-swap operator: (qk @ swap) per head = [-x2 | x1].
    blk = jnp.zeros((HEAD_DIM, HEAD_DIM), jnp.float32)
    idx = jnp.arange(ROTARY_HALF)
    blk = blk.at[idx + ROTARY_HALF, idx].set(-1.0)            # first half gets -x2
    blk = blk.at[idx, idx + ROTARY_HALF].set(1.0)             # second half gets +x1
    swap = jnp.kron(jnp.eye(2 * NUM_HEADS, dtype=jnp.float32), blk)   # (2H, 2H)

    # Additive bias: key padding + block-diagonal batch separation (batch rows
    # are stacked along sublanes, so cross-batch keys must be masked out).
    row_batch = jnp.repeat(jnp.arange(bs), seqlen)            # (rows,)
    valid = attn_mask.reshape(-1) > 0                         # (rows,)
    keep = (row_batch[:, None] == row_batch[None, :]) & valid[None, :]
    bias = jnp.where(keep, 0.0, NEG_INF).astype(jnp.float32)  # (rows, rows)

    qkv2d = qkv.reshape(rows, three_hidden)                   # batch along sublanes
    wt = wo_w.T.astype(jnp.bfloat16)                          # one-time transpose
    b2 = wo_b.reshape(1, HIDDEN).astype(jnp.float32)

    # TODO(synk): on v7x (2 TensorCores) a 2-wide "parallel" leading grid axis
    # can be re-introduced (gate on pltpu.get_tpu_info()); at this toy size a
    # single step is fastest on v5e/v6e.
    out2d = pl.pallas_call(
        _fused_attention_kernel,
        out_shape=jax.ShapeDtypeStruct((rows, HIDDEN), qkv.dtype),
        grid=(1,),
        in_specs=[
            pl.BlockSpec((rows, rows), lambda i: (0, 0)),             # bias
            pl.BlockSpec((rows, three_hidden), lambda i: (0, 0)),     # qkv
            pl.BlockSpec((rows, QK_WIDTH), lambda i: (0, 0)),         # cos
            pl.BlockSpec((rows, QK_WIDTH), lambda i: (0, 0)),         # sin
            pl.BlockSpec((QK_WIDTH, QK_WIDTH), lambda i: (0, 0)),     # swap op
            pl.BlockSpec((HIDDEN, HIDDEN), lambda i: (0, 0)),         # Wo^T (bf16)
            pl.BlockSpec((1, HIDDEN), lambda i: (0, 0)),              # Wo bias
        ],
        out_specs=pl.BlockSpec((rows, HIDDEN), lambda i: (0, 0)),
        scratch_shapes=[pltpu.VMEM((rows, HIDDEN), jnp.float32)],
        compiler_params=pltpu.CompilerParams(
            dimension_semantics=("arbitrary",)),
    )(bias, qkv2d, cos_qk, sin_qk, swap, wt, b2)

    # out_drop is Identity (attn_out_dropout_prob = 0.0)
    return out2d.reshape(bs, seqlen, HIDDEN)


# --------------------------- reference (pure JAX) -----------------------------
def _apply_rope_ref(x, cos, sin):
    half = ROTARY_DIM // 2
    x1 = x[..., :half]
    x2 = x[..., half:ROTARY_DIM]
    rest = x[..., ROTARY_DIM:]
    return jnp.concatenate([x1 * cos - x2 * sin, x2 * cos + x1 * sin, rest],
                           axis=-1)


def _reference(qkv, attn_mask, wo_w, wo_b):
    bs, seqlen, _ = qkv.shape
    qkv = qkv.reshape(bs, seqlen, 3, NUM_HEADS, HEAD_DIM)
    inv_freq = 1.0 / (ROTARY_BASE ** (
        jnp.arange(0, ROTARY_DIM, 2, dtype=jnp.float32) / ROTARY_DIM))
    freqs = jnp.outer(jnp.arange(seqlen, dtype=jnp.float32), inv_freq)
    cos = jnp.cos(freqs)[None, :, None, :]
    sin = jnp.sin(freqs)[None, :, None, :]
    q = _apply_rope_ref(qkv[:, :, 0], cos, sin).transpose(0, 2, 1, 3)
    k = _apply_rope_ref(qkv[:, :, 1], cos, sin).transpose(0, 2, 1, 3)
    v = qkv[:, :, 2].transpose(0, 2, 1, 3)
    s = jnp.einsum("bhqd,bhkd->bhqk", q, k) / math.sqrt(HEAD_DIM)
    s = jnp.where(attn_mask[:, None, None, :] > 0, s, NEG_INF)
    p = jax.nn.softmax(s, axis=-1)
    o = jnp.einsum("bhqk,bhkd->bhqd", p, v)
    o = o.transpose(0, 2, 1, 3).reshape(bs, seqlen, HIDDEN)
    return o @ wo_w.T + wo_b[None, None, :]


# ------------------------------- main ----------------------------------------
if __name__ == "__main__":
    key = jax.random.PRNGKey(0)
    k_qkv, k_w, k_b = jax.random.split(key, 3)

    qkv = jax.random.normal(k_qkv, (BATCH, SEQLEN, 3 * HIDDEN), dtype=jnp.float32)

    # padding mask: batch 0 fully valid, batch 1 has last 3 tokens padded
    attn_mask = jnp.ones((BATCH, SEQLEN), dtype=jnp.int32)
    attn_mask = attn_mask.at[1, SEQLEN - 3:].set(0)

    # deterministic synthetic Wo parameters (nn.Linear(hidden, hidden, bias=True))
    wo_w = 0.02 * jax.random.normal(k_w, (HIDDEN, HIDDEN), dtype=jnp.float32)
    wo_b = 0.01 * jax.random.normal(k_b, (HIDDEN,), dtype=jnp.float32)

    out = flexbert_padded_rope_parallel_attention(qkv, attn_mask, wo_w, wo_b)
    out = jax.block_until_ready(out)

    ref = _reference(qkv, attn_mask, wo_w, wo_b)
    assert out.shape == (BATCH, SEQLEN, HIDDEN)
    assert jnp.allclose(out, ref, atol=1e-2, rtol=1e-2), "mismatch vs reference"

    # TODO(synk): attention dropout (p_dropout > 0) and the FA2 sliding-window
    # path are not modeled; at production FlexBERT sizes the K/V axis should be
    # tiled flash-style (online softmax), the RoPE half-swap done with
    # pltpu.roll, and v7x tiling re-derived for its 64 MiB VMEM / 2 TCs.
    print("KERNEL_OK")
</pallas_src>

<mosaic_0001>
module attributes {stable_mosaic.version = 11 : i64} {
  func.func @_fused_attention_kernel(%arg0: i32, %arg1: memref<16x16xf32, #tpu.memory_space<vmem>>, %arg2: memref<16x96xf32, #tpu.memory_space<vmem>>, %arg3: memref<16x64xf32, #tpu.memory_space<vmem>>, %arg4: memref<16x64xf32, #tpu.memory_space<vmem>>, %arg5: memref<64x64xf32, #tpu.memory_space<vmem>>, %arg6: memref<32x32xbf16, #tpu.memory_space<vmem>>, %arg7: memref<1x32xf32, #tpu.memory_space<vmem>>, %arg8: memref<16x32xf32, #tpu.memory_space<vmem>>, %arg9: memref<16x32xf32, #tpu.memory_space<vmem>>) attributes {dimension_semantics = [#tpu.dimension_semantics<arbitrary>], iteration_bounds = array<i64: 1>, scalar_prefetch = 0 : i64, scratch_operands = 1 : i64, tpu.core_type = #tpu.core_type<tc>, window_params = [{pipeline_mode = #tpu.pipeline_mode<synchronous>, transform_indices = @transform_0, window_bounds = array<i64: 16, 16>}, {pipeline_mode = #tpu.pipeline_mode<synchronous>, transform_indices = @transform_1, window_bounds = array<i64: 16, 96>}, {pipeline_mode = #tpu.pipeline_mode<synchronous>, transform_indices = @transform_2, window_bounds = array<i64: 16, 64>}, {pipeline_mode = #tpu.pipeline_mode<synchronous>, transform_indices = @transform_3, window_bounds = array<i64: 16, 64>}, {pipeline_mode = #tpu.pipeline_mode<synchronous>, transform_indices = @transform_4, window_bounds = array<i64: 64, 64>}, {pipeline_mode = #tpu.pipeline_mode<synchronous>, transform_indices = @transform_5, window_bounds = array<i64: 32, 32>}, {pipeline_mode = #tpu.pipeline_mode<synchronous>, transform_indices = @transform_6, window_bounds = array<i64: 1, 32>}, {pipeline_mode = #tpu.pipeline_mode<synchronous>, transform_indices = @transform_7, window_bounds = array<i64: 16, 32>}]} {
    %c0 = arith.constant 0 : index
    %c0_0 = arith.constant 0 : index
    %0 = vector.load %arg2[%c0, %c0_0] : memref<16x96xf32, #tpu.memory_space<vmem>>, vector<16x96xf32>
    %1 = vector.extract_strided_slice %0 {offsets = [0, 0], sizes = [16, 64], strides = [1, 1]} : vector<16x96xf32> to vector<16x64xf32>
    %c0_1 = arith.constant 0 : index
    %c0_2 = arith.constant 0 : index
    %2 = vector.load %arg5[%c0_1, %c0_2] : memref<64x64xf32, #tpu.memory_space<vmem>>, vector<64x64xf32>
    %cst = arith.constant dense<0.000000e+00> : vector<16x64xf32>
    %3 = tpu.matmul %1, %2, %cst {dimension_numbers = #tpu.dot_dimension_numbers<[1], [0], [0], [1], [0, 0, 1, 1], [], []>} : vector<16x64xf32>, vector<64x64xf32>, vector<16x64xf32> -> vector<16x64xf32>
    %c0_3 = arith.constant 0 : index
    %c0_4 = arith.constant 0 : index
    %4 = vector.load %arg3[%c0_3, %c0_4] : memref<16x64xf32, #tpu.memory_space<vmem>>, vector<16x64xf32>
    %5 = arith.mulf %1, %4 : vector<16x64xf32>
    %c0_5 = arith.constant 0 : index
    %c0_6 = arith.constant 0 : index
    %6 = vector.load %arg4[%c0_5, %c0_6] : memref<16x64xf32, #tpu.memory_space<vmem>>, vector<16x64xf32>
    %7 = arith.mulf %3, %6 : vector<16x64xf32>
    %8 = arith.addf %5, %7 : vector<16x64xf32>
    %9 = arith.truncf %8 : vector<16x64xf32> to vector<16x64xbf16>
    %c0_7 = arith.constant 0 : index
    %c0_8 = arith.constant 0 : index
    %10 = vector.load %arg1[%c0_7, %c0_8] : memref<16x16xf32, #tpu.memory_space<vmem>>, vector<16x16xf32>
    %11 = vector.extract_strided_slice %9 {offsets = [0, 0], sizes = [16, 8], strides = [1, 1]} : vector<16x64xbf16> to vector<16x8xbf16>
    %12 = vector.extract_strided_slice %9 {offsets = [0, 32], sizes = [16, 8], strides = [1, 1]} : vector<16x64xbf16> to vector<16x8xbf16>
    %13 = vector.extract_strided_slice %0 {offsets = [0, 64], sizes = [16, 8], strides = [1, 1]} : vector<16x96xf32> to vector<16x8xf32>
    %14 = arith.truncf %13 : vector<16x8xf32> to vector<16x8xbf16>
    %cst_9 = arith.constant dense<0.000000e+00> : vector<16x16xf32>
    %15 = tpu.matmul %11, %12, %cst_9 {dimension_numbers = #tpu.dot_dimension_numbers<[1], [1], [0], [0], [0, 0, 1, 0], [], []>} : vector<16x8xbf16>, vector<16x8xbf16>, vector<16x16xf32> -> vector<16x16xf32>
    %16 = arith.addf %15, %10 : vector<16x16xf32>
    %cst_10 = arith.constant dense<0xFF800000> : vector<16xf32>
    %17 = vector.multi_reduction <maximumf>, %16, %cst_10 [1] : vector<16x16xf32> to vector<16xf32>
    %18 = vector.shape_cast %17 : vector<16xf32> to vector<16x1xf32>
    %19 = vector.broadcast %18 : vector<16x1xf32> to vector<16x16xf32>
    %20 = arith.subf %16, %19 : vector<16x16xf32>
    %21 = math.exp %20 : vector<16x16xf32>
    %cst_11 = arith.constant dense<0.000000e+00> : vector<16xf32>
    %22 = vector.multi_reduction <add>, %21, %cst_11 [1] : vector<16x16xf32> to vector<16xf32>
    %23 = vector.shape_cast %22 : vector<16xf32> to vector<16x1xf32>
    %24 = arith.truncf %21 : vector<16x16xf32> to vector<16x16xbf16>
    %cst_12 = arith.constant dense<0.000000e+00> : vector<16x8xf32>
    %25 = tpu.matmul %24, %14, %cst_12 {dimension_numbers = #tpu.dot_dimension_numbers<[1], [0], [0], [1], [0, 0, 1, 1], [], []>} : vector<16x16xbf16>, vector<16x8xbf16>, vector<16x8xf32> -> vector<16x8xf32>
    %26 = vector.broadcast %23 : vector<16x1xf32> to vector<16x8xf32>
    %27 = arith.divf %25, %26 : vector<16x8xf32>
    %c0_13 = arith.constant 0 : index
    %c0_14 = arith.constant 0 : index
    %28 = vector.load %arg9[%c0_13, %c0_14] : memref<16x32xf32, #tpu.memory_space<vmem>>, vector<16x8xf32>
    tpu.vector_store %arg9[%c0_13, %c0_14], %27 {strides = array<i32>} : memref<16x32xf32, #tpu.memory_space<vmem>>, vector<16x8xf32>,
    %29 = vector.extract_strided_slice %9 {offsets = [0, 8], sizes = [16, 8], strides = [1, 1]} : vector<16x64xbf16> to vector<16x8xbf16>
    %30 = vector.extract_strided_slice %9 {offsets = [0, 40], sizes = [16, 8], strides = [1, 1]} : vector<16x64xbf16> to vector<16x8xbf16>
    %31 = vector.extract_strided_slice %0 {offsets = [0, 72], sizes = [16, 8], strides = [1, 1]} : vector<16x96xf32> to vector<16x8xf32>
    %32 = arith.truncf %31 : vector<16x8xf32> to vector<16x8xbf16>
    %cst_15 = arith.constant dense<0.000000e+00> : vector<16x16xf32>
    %33 = tpu.matmul %29, %30, %cst_15 {dimension_numbers = #tpu.dot_dimension_numbers<[1], [1], [0], [0], [0, 0, 1, 0], [], []>} : vector<16x8xbf16>, vector<16x8xbf16>, vector<16x16xf32> -> vector<16x16xf32>
    %34 = arith.addf %33, %10 : vector<16x16xf32>
    %cst_16 = arith.constant dense<0xFF800000> : vector<16xf32>
    %35 = vector.multi_reduction <maximumf>, %34, %cst_16 [1] : vector<16x16xf32> to vector<16xf32>
    %36 = vector.shape_cast %35 : vector<16xf32> to vector<16x1xf32>
    %37 = vector.broadcast %36 : vector<16x1xf32> to vector<16x16xf32>
    %38 = arith.subf %34, %37 : vector<16x16xf32>
    %39 = math.exp %38 : vector<16x16xf32>
    %cst_17 = arith.constant dense<0.000000e+00> : vector<16xf32>
    %40 = vector.multi_reduction <add>, %39, %cst_17 [1] : vector<16x16xf32> to vector<16xf32>
    %41 = vector.shape_cast %40 : vector<16xf32> to vector<16x1xf32>
    %42 = arith.truncf %39 : vector<16x16xf32> to vector<16x16xbf16>
    %cst_18 = arith.constant dense<0.000000e+00> : vector<16x8xf32>
    %43 = tpu.matmul %42, %32, %cst_18 {dimension_numbers = #tpu.dot_dimension_numbers<[1], [0], [0], [1], [0, 0, 1, 1], [], []>} : vector<16x16xbf16>, vector<16x8xbf16>, vector<16x8xf32> -> vector<16x8xf32>
    %44 = vector.broadcast %41 : vector<16x1xf32> to vector<16x8xf32>
    %45 = arith.divf %43, %44 : vector<16x8xf32>
    %c0_19 = arith.constant 0 : index
    %c8 = arith.constant 8 : index
    %46 = vector.load %arg9[%c0_19, %c8] : memref<16x32xf32, #tpu.memory_space<vmem>>, vector<16x8xf32>
    tpu.vector_store %arg9[%c0_19, %c8], %45 {strides = array<i32>} : memref<16x32xf32, #tpu.memory_space<vmem>>, vector<16x8xf32>,
    %47 = vector.extract_strided_slice %9 {offsets = [0, 16], sizes = [16, 8], strides = [1, 1]} : vector<16x64xbf16> to vector<16x8xbf16>
    %48 = vector.extract_strided_slice %9 {offsets = [0, 48], sizes = [16, 8], strides = [1, 1]} : vector<16x64xbf16> to vector<16x8xbf16>
    %49 = vector.extract_strided_slice %0 {offsets = [0, 80], sizes = [16, 8], strides = [1, 1]} : vector<16x96xf32> to vector<16x8xf32>
    %50 = arith.truncf %49 : vector<16x8xf32> to vector<16x8xbf16>
    %cst_20 = arith.constant dense<0.000000e+00> : vector<16x16xf32>
    %51 = tpu.matmul %47, %48, %cst_20 {dimension_numbers = #tpu.dot_dimension_numbers<[1], [1], [0], [0], [0, 0, 1, 0], [], []>} : vector<16x8xbf16>, vector<16x8xbf16>, vector<16x16xf32> -> vector<16x16xf32>
    %52 = arith.addf %51, %10 : vector<16x16xf32>
    %cst_21 = arith.constant dense<0xFF800000> : vector<16xf32>
    %53 = vector.multi_reduction <maximumf>, %52, %cst_21 [1] : vector<16x16xf32> to vector<16xf32>
    %54 = vector.shape_cast %53 : vector<16xf32> to vector<16x1xf32>
    %55 = vector.broadcast %54 : vector<16x1xf32> to vector<16x16xf32>
    %56 = arith.subf %52, %55 : vector<16x16xf32>
    %57 = math.exp %56 : vector<16x16xf32>
    %cst_22 = arith.constant dense<0.000000e+00> : vector<16xf32>
    %58 = vector.multi_reduction <add>, %57, %cst_22 [1] : vector<16x16xf32> to vector<16xf32>
    %59 = vector.shape_cast %58 : vector<16xf32> to vector<16x1xf32>
    %60 = arith.truncf %57 : vector<16x16xf32> to vector<16x16xbf16>
    %cst_23 = arith.constant dense<0.000000e+00> : vector<16x8xf32>
    %61 = tpu.matmul %60, %50, %cst_23 {dimension_numbers = #tpu.dot_dimension_numbers<[1], [0], [0], [1], [0, 0, 1, 1], [], []>} : vector<16x16xbf16>, vector<16x8xbf16>, vector<16x8xf32> -> vector<16x8xf32>
    %62 = vector.broadcast %59 : vector<16x1xf32> to vector<16x8xf32>
    %63 = arith.divf %61, %62 : vector<16x8xf32>
    %c0_24 = arith.constant 0 : index
    %c16 = arith.constant 16 : index
    %64 = vector.load %arg9[%c0_24, %c16] : memref<16x32xf32, #tpu.memory_space<vmem>>, vector<16x8xf32>
    tpu.vector_store %arg9[%c0_24, %c16], %63 {strides = array<i32>} : memref<16x32xf32, #tpu.memory_space<vmem>>, vector<16x8xf32>,
    %65 = vector.extract_strided_slice %9 {offsets = [0, 24], sizes = [16, 8], strides = [1, 1]} : vector<16x64xbf16> to vector<16x8xbf16>
    %66 = vector.extract_strided_slice %9 {offsets = [0, 56], sizes = [16, 8], strides = [1, 1]} : vector<16x64xbf16> to vector<16x8xbf16>
    %67 = vector.extract_strided_slice %0 {offsets = [0, 88], sizes = [16, 8], strides = [1, 1]} : vector<16x96xf32> to vector<16x8xf32>
    %68 = arith.truncf %67 : vector<16x8xf32> to vector<16x8xbf16>
    %cst_25 = arith.constant dense<0.000000e+00> : vector<16x16xf32>
    %69 = tpu.matmul %65, %66, %cst_25 {dimension_numbers = #tpu.dot_dimension_numbers<[1], [1], [0], [0], [0, 0, 1, 0], [], []>} : vector<16x8xbf16>, vector<16x8xbf16>, vector<16x16xf32> -> vector<16x16xf32>
    %70 = arith.addf %69, %10 : vector<16x16xf32>
    %cst_26 = arith.constant dense<0xFF800000> : vector<16xf32>
    %71 = vector.multi_reduction <maximumf>, %70, %cst_26 [1] : vector<16x16xf32> to vector<16xf32>
    %72 = vector.shape_cast %71 : vector<16xf32> to vector<16x1xf32>
    %73 = vector.broadcast %72 : vector<16x1xf32> to vector<16x16xf32>
    %74 = arith.subf %70, %73 : vector<16x16xf32>
    %75 = math.exp %74 : vector<16x16xf32>
    %cst_27 = arith.constant dense<0.000000e+00> : vector<16xf32>
    %76 = vector.multi_reduction <add>, %75, %cst_27 [1] : vector<16x16xf32> to vector<16xf32>
    %77 = vector.shape_cast %76 : vector<16xf32> to vector<16x1xf32>
    %78 = arith.truncf %75 : vector<16x16xf32> to vector<16x16xbf16>
    %cst_28 = arith.constant dense<0.000000e+00> : vector<16x8xf32>
    %79 = tpu.matmul %78, %68, %cst_28 {dimension_numbers = #tpu.dot_dimension_numbers<[1], [0], [0], [1], [0, 0, 1, 1], [], []>} : vector<16x16xbf16>, vector<16x8xbf16>, vector<16x8xf32> -> vector<16x8xf32>
    %80 = vector.broadcast %77 : vector<16x1xf32> to vector<16x8xf32>
    %81 = arith.divf %79, %80 : vector<16x8xf32>
    %c0_29 = arith.constant 0 : index
    %c24 = arith.constant 24 : index
    %82 = vector.load %arg9[%c0_29, %c24] : memref<16x32xf32, #tpu.memory_space<vmem>>, vector<16x8xf32>
    tpu.vector_store %arg9[%c0_29, %c24], %81 {strides = array<i32>} : memref<16x32xf32, #tpu.memory_space<vmem>>, vector<16x8xf32>,
    %c0_30 = arith.constant 0 : index
    %c0_31 = arith.constant 0 : index
    %83 = vector.load %arg9[%c0_30, %c0_31] : memref<16x32xf32, #tpu.memory_space<vmem>>, vector<16x32xf32>
    %84 = arith.truncf %83 : vector<16x32xf32> to vector<16x32xbf16>
    %c0_32 = arith.constant 0 : index
    %c0_33 = arith.constant 0 : index
    %85 = vector.load %arg6[%c0_32, %c0_33] : memref<32x32xbf16, #tpu.memory_space<vmem>>, vector<32x32xbf16>
    %cst_34 = arith.constant dense<0.000000e+00> : vector<16x32xf32>
    %86 = tpu.matmul %84, %85, %cst_34 {dimension_numbers = #tpu.dot_dimension_numbers<[1], [0], [0], [1], [0, 0, 1, 1], [], []>} : vector<16x32xbf16>, vector<32x32xbf16>, vector<16x32xf32> -> vector<16x32xf32>
    %c0_35 = arith.constant 0 : index
    %c0_36 = arith.constant 0 : index
    %87 = vector.load %arg7[%c0_35, %c0_36] : memref<1x32xf32, #tpu.memory_space<vmem>>, vector<1x32xf32>
    %88 = vector.broadcast %87 : vector<1x32xf32> to vector<16x32xf32>
    %89 = arith.addf %86, %88 : vector<16x32xf32>
    %c0_37 = arith.constant 0 : index
    %c0_38 = arith.constant 0 : index
    %90 = vector.load %arg8[%c0_37, %c0_38] : memref<16x32xf32, #tpu.memory_space<vmem>>, vector<16x32xf32>
    tpu.vector_store %arg8[%c0_37, %c0_38], %89 {strides = array<i32>} : memref<16x32xf32, #tpu.memory_space<vmem>>, vector<16x32xf32>,
    return
  }
  func.func @transform_0(%arg0: i32) -> (i32, i32) {
    %c0_i32 = arith.constant 0 : i32
    %c0_i32_0 = arith.constant 0 : i32
    %c0_i32_1 = arith.constant 0 : i32
    return %c0_i32, %c0_i32_0 : i32, i32
  }
  func.func @transform_1(%arg0: i32) -> (i32, i32) {
    %c0_i32 = arith.constant 0 : i32
    %c0_i32_0 = arith.constant 0 : i32
    %c0_i32_1 = arith.constant 0 : i32
    return %c0_i32, %c0_i32_0 : i32, i32
  }
  func.func @transform_2(%arg0: i32) -> (i32, i32) {
    %c0_i32 = arith.constant 0 : i32
    %c0_i32_0 = arith.constant 0 : i32
    %c0_i32_1 = arith.constant 0 : i32
    return %c0_i32, %c0_i32_0 : i32, i32
  }
  func.func @transform_3(%arg0: i32) -> (i32, i32) {
    %c0_i32 = arith.constant 0 : i32
    %c0_i32_0 = arith.constant 0 : i32
    %c0_i32_1 = arith.constant 0 : i32
    return %c0_i32, %c0_i32_0 : i32, i32
  }
  func.func @transform_4(%arg0: i32) -> (i32, i32) {
    %c0_i32 = arith.constant 0 : i32
    %c0_i32_0 = arith.constant 0 : i32
    %c0_i32_1 = arith.constant 0 : i32
    return %c0_i32, %c0_i32_0 : i32, i32
  }
  func.func @transform_5(%arg0: i32) -> (i32, i32) {
    %c0_i32 = arith.constant 0 : i32
    %c0_i32_0 = arith.constant 0 : i32
    %c0_i32_1 = arith.constant 0 : i32
    return %c0_i32, %c0_i32_0 : i32, i32
  }
  func.func @transform_6(%arg0: i32) -> (i32, i32) {
    %c0_i32 = arith.constant 0 : i32
    %c0_i32_0 = arith.constant 0 : i32
    %c0_i32_1 = arith.constant 0 : i32
    return %c0_i32, %c0_i32_0 : i32, i32
  }
  func.func @transform_7(%arg0: i32) -> (i32, i32) {
    %c0_i32 = arith.constant 0 : i32
    %c0_i32_0 = arith.constant 0 : i32
    %c0_i32_1 = arith.constant 0 : i32
    return %c0_i32, %c0_i32_0 : i32, i32
  }
}

</mosaic_0001>

<bundles_post_ra>
// kernel: tile.29
= control target key start
LH: loop header
LB: loop body
LE: loop exit
PB: predicated region body
PF: predicated region fallthrough
CT: control target
= control target key end

     0   :  { %vm43_vm0 = vcmask 1047556   ;;  %vm45_vm1 = vcmask 64512   ;;  %s94_s22 = smov 8   ;;  %s95_s25 = smov 16   ;;  %vm55_vm2 = vcmask 261312   ;;  %vm65_vm3 = vcmask 195712   ;;  %s147_s0 = inlined_call_operand.vmem [shape: f32[8,4,8], index: 0, kind: input, shape index: {}]   ;;  %s148_s1 = inlined_call_operand.vmem [shape: f32[8,32], index: 1, kind: output, shape index: {}]  }
   0x1   :  { %v83_v0 = vld [vmem:[%s147_s0 + $0x1c] sm:$0xf]  ;;  %v84_v1 = vld [vmem:[%s147_s0 + $0x18] sm:$0xf]  ;;  %v85_v2 = vld [vmem:[%s147_s0 + $0x14] sm:$0xf] }
   0x2   :  { %9 = vst [vmem:[#allocation0 + $0x38] sm:$0xf] %v83_v0  ;;  %14 = vst [vmem:[#allocation0 + $0x30] sm:$0xf] %v84_v1  ;;  %v86_v3 = vld [vmem:[%s147_s0 + $0x10] sm:$0xf] }
   0x3   :  { %19 = vst [vmem:[#allocation0 + $0x28] sm:$0xf] %v85_v2  ;;  %v87_v4 = vld [vmem:[%s147_s0 + $0xc] sm:$0xf]  ;;  %v88_v5 = vld [vmem:[%s147_s0 + $0x8] sm:$0xf] }
   0x4   :  { %24 = vst [vmem:[#allocation0 + $0x20] sm:$0xf] %v86_v3  ;;  %29 = vst [vmem:[#allocation0 + $0x18] sm:$0xf] %v87_v4  ;;  %v89_v6 = vld [vmem:[%s147_s0 + $0x4] sm:$0xf] }
   0x5   :  { %34 = vst [vmem:[#allocation0 + $0x10] sm:$0xf] %v88_v5  ;;  %v39_v7 = vld [vmem:[%s147_s0] sm:$0xf]  ;;  %38 = vst [vmem:[#allocation0 + $0x8] sm:$0xf] %v89_v6 }
   0x6   :  { %40 = vst [vmem:[#allocation0] sm:$0xf] %v39_v7  ;;  %s93_s0 = smov 24   ;;  %vm75_vm4 = vcmask 130112  }
   0xb   :  { %v50_v8 = vld [vmem:[#allocation0 + $0x3] ss:$8 sm:$0xf0]   ;;  %v60_v9 = vld [vmem:[#allocation0 + $0x2] ss:$8 sm:$0xf0]  }
   0xc   :  { %v70_v14 = vld [vmem:[#allocation0 + $0x1] ss:$8 sm:$0xf0]   ;;  %v42_v17 = vld [vmem:[#allocation0] ss:$8 sm:$0xf0]  }
   0xd   :  { %v48_v10 = vld [vmem:[#allocation0 + $0x3] ss:$8 sm:$0xf]   ;;  %v58_v11 = vld [vmem:[#allocation0 + $0x2] ss:$8 sm:$0xf]  }
   0xe   :  { %v52_v12 = vsel %vm43_vm0, %v50_v8, %v48_v10  ;;  %v68_v13 = vld [vmem:[#allocation0 + $0x1] ss:$8 sm:$0xf]   ;;  %v41_v16 = vld [vmem:[#allocation0] ss:$8 sm:$0xf]   ;;  %v62_v18 = vsel %vm43_vm0, %v60_v9, %v58_v11 }
   0xf   :  { %53 = vrot.lane.b32.xlu0 %v52_v12, %s93_s0  ;;  %v72_v15 = vsel %vm43_vm0, %v70_v14, %v68_v13  ;;  %v44_v19 = vsel %vm43_vm0, %v42_v17, %v41_v16 }
  0x10   :  { %73 = vrot.lane.b32.xlu1 %v72_v15, %s94_s22  ;;  %46 = vst.msk [vmem:[%s148_s1] sm:$0xff] %vm45_vm1, %v44_v19  }
  0x13   :  { %63 = vrot.lane.b32.xlu0 %v62_v18, %s95_s25 }
  0x81   :  { %v54_v20 = vpop.permute.xlu0 %53  }
  0x82   :  { %56 = vst.msk [vmem:[%s148_s1] sm:$0xff] %vm55_vm2, %v54_v20   ;;  %v74_v21 = vpop.permute.xlu1 %73  }
  0x85   :  { %v64_v22 = vpop.permute.xlu0 %63  }
  0x86   :  { %66 = vst.msk [vmem:[%s148_s1] sm:$0xff] %vm65_vm3, %v64_v22  }
  0x87   :  { %76 = vst.msk [vmem:[%s148_s1] sm:$0xff] %vm75_vm4, %v74_v21  }

// kernel: eq.10
= control target key start
LH: loop header
LB: loop body
LE: loop exit
PB: predicated region body
PF: predicated region fallthrough
CT: control target
= control target key end

     0   :  { %vm8_vm0 = vcmask 64512   ;;  %vm14_vm1 = vcmask 130112   ;;  %s42_s0 = inlined_call_operand.vmem [shape: s32[2,8], index: 0, kind: input, shape index: {}]   ;;  %s43_s1 = inlined_call_operand.vmem [shape: s32[16], index: 1, kind: output, shape index: {}]  }
   0x1   :  { %v5_v0 = vld [vmem:[%s42_s0] sm:$0x3]  ;;  %s25_s0 = smov 8  }
   0x2   :  { %6 = vst [vmem:[#allocation1] sm:$0x3] %v5_v0 }
   0x9   :  { %v11_v1 = vld [vmem:[#allocation1 + $0x1] sm:$0x1]   ;;  %v7_v2 = vld [vmem:[#allocation1] sm:$0x1]  }
   0xa   :  { %12 = vrot.lane.b32.xlu0 %v11_v1, %s25_s0  ;;  %9 = vst.msk [vmem:[#allocation0] sm:$0x1] %vm8_vm0, %v7_v2  }
  0x7c   :  { %v13_v3 = vpop.permute.xlu0 %12  }
  0x7d   :  { %15 = vst.msk [vmem:[#allocation0] sm:$0x1] %vm14_vm1, %v13_v3  }
  0x84   :  { %v20_v4 = vld [vmem:[#allocation0] sm:$0x1] }
  0x85   :  { %23 = vst [vmem:[%s43_s1] sm:$0x1] %v20_v4 }

// kernel: flexbert_padded_rope_parallel_attention.1
= control target key start
LH: loop header
LB: loop body
LE: loop exit
PB: predicated region body
PF: predicated region fallthrough
CT: control target
= control target key end

     0   :  { %vm38_vm0 = vcmask 523264   ;;  %s1131_s0 = inlined_call_operand.vmem [shape: f32[16,16], index: 0, kind: input, shape index: {}]   ;;  %s1132_s1 = inlined_call_operand.vmem [shape: f32[16,96], index: 1, kind: input, shape index: {}]   ;;  %s1133_s2 = inlined_call_operand.vmem [shape: f32[16,64], index: 2, kind: input, shape index: {}]   ;;  %s1134_s3 = inlined_call_operand.vmem [shape: f32[16,64], index: 3, kind: input, shape index: {}]   ;;  %s1135_s4 = inlined_call_operand.vmem [shape: f32[64,64], index: 4, kind: input, shape index: {}]   ;;  %s1136_s5 = inlined_call_operand.vmem [shape: bf16[32,32], index: 5, kind: input, shape index: {}]   ;;  %s1137_s6 = inlined_call_operand.vmem [shape: f32[1,32], index: 6, kind: input, shape index: {}]   ;;  %s1138_s7 = inlined_call_operand.hbm [shape: f32[16,32], index: 7, kind: output, shape index: {}]  }
   0x1   :  { %v37_v0 = vld [vmem:[%s1135_s4 + $0x38] sm:$0xff]  ;;  %v36_v1 = vld [vmem:[%s1135_s4 + $0x30] sm:$0xff]  ;;  %v35_v2 = vld [vmem:[%s1135_s4 + $0x28] sm:$0xff] }
   0x2   :  { %787 = vmatprep.subr.mxu0 %v37_v0  ;;  %v1006_v3 = vld [vmem:[%s1132_s1] sm:$0xff] }
   0x3   :  { %788 = vmatpush3.msra.mxu0 %v37_v0  ;;  %v34_v4 = vld [vmem:[%s1135_s4 + $0x20] sm:$0xff]  ;;  %803 = vmatprep.mubr.msk.f32.mxu0 %vm38_vm0, %v1006_v3 }
   0x4   :  { %789 = vmatprep.subr.mxu0 %v36_v1 }
   0x5   :  { %790 = vmatpush3.msra.mxu0 %v36_v1 }
   0x6   :  { %791 = vmatprep.subr.mxu0 %v35_v2 }
   0x7   :  { %12 = vsyncpa [#allocation4], 0  ;;  %792 = vmatpush3.msra.mxu0 %v35_v2  ;;  %v33_v5 = vld [vmem:[%s1135_s4 + $0x18] sm:$0xff]  ;;  %v32_v6 = vld [vmem:[%s1135_s4 + $0x10] sm:$0xff]  ;;  %v936_v10 = vmov 0.0   ;;  %vm937_vm1 = vmmov 0  }
   0x8   :  { %793 = vmatprep.subr.mxu0 %v34_v4  ;;  %v31_v7 = vld [vmem:[%s1135_s4 + $0x8] sm:$0xff]  ;;  %v30_v8 = vld [vmem:[%s1135_s4] sm:$0xff]  ;;  %806 = vmatprep.subr.bf16.mxu1 %v936_v10  ;;  %s940_s27 = smov 80   ;;  %s941_s28 = smov 88   ;;  %vm137_vm2 = vcmask 64512   ;;  %vm185_vm3 = vcmask 130048  }
   0x9   :  { %794 = vmatpush3.msra.mxu0 %v34_v4  ;;  %v1028_v9 = vld [vmem:[%s1132_s1 + $0x8] sm:$0xff]  ;;  %v120_v11 = vld [vmem:[%s1133_s2] sm:$0xff]  ;;  %808 = vmatprep.mubr.msk.bf16.mxu1 %vm937_vm1, %v936_v10  ;;  %s942_s29 = smov 72   ;;  %s943_s30 = smov 112   ;;  %vm388_vm4 = vcmask 130112   ;;  %vm520_vm5 = vcmask 195712  }
   0xa   :  { %795 = vmatprep.subr.mxu0 %v33_v5  ;;  %v121_v12 = vld [vmem:[%s1133_s2 + $0x8] sm:$0xff]  ;;  %v124_v15 = vld [vmem:[%s1134_s3] sm:$0xff]  ;;  %v122_v16 = vmul.f32 %v120_v11, %v1006_v3  ;;  %s938_s2 = smov 120   ;;  %s944_s8 = smov 104   ;;  %v133_v62 = vpack.c.bf16 %v1028_v9, %v1006_v3  ;;  %vm652_vm6 = vcmask 261312   ;;  %vm681_vm7 = vcmask 261120  }
   0xb   :  { %796 = vmatpush3.msra.mxu0 %v33_v5  ;;  %v125_v13 = vld [vmem:[%s1134_s3 + $0x8] sm:$0xff]  ;;  %v123_v17 = vmul.f32 %v121_v12, %v1028_v9  ;;  %s939_s3 = smov 96   ;;  %v131_v35 = vld [vmem:[%s1131_s0] sm:$0xff]  ;;  %s946_s13 = smov 64  }
   0xc   :  { %797 = vmatprep.subr.mxu0 %v32_v6  ;;  %v132_v40 = vld [vmem:[%s1131_s0 + $0x8] sm:$0xff]  ;;  %s945_s0 = smov 56   ;;  %s947_s14 = smov 48  }
   0xd   :  { %798 = vmatpush3.msra.mxu0 %v32_v6  ;;  %s948_s15 = smov 40   ;;  %s949_s16 = smov 8  }
   0xe   :  { %799 = vmatprep.subr.mxu0 %v31_v7  ;;  %s950_s19 = smov 16   ;;  %s951_s22 = smov 24  }
   0xf   :  { %800 = vmatpush3.msra.mxu0 %v31_v7  ;;  %s952_s23 = smov [#allocation3]  }
  0x10   :  { %801 = vmatprep.subr.mxu0 %v30_v8  ;;  %s733_s1 = sshll.u32 %s952_s23, 4  ;;  %s734_s1 = int_to_ptr.vmem [resolvable:$true] %s733_s1 }
  0x11   :  { %802 = vmatpush3.msra.mxu0 %v30_v8  ;;  %s914_s24 = scalar_lea.vmem %s734_s1, 256  ;;  %p919_p1 = scmp.lt.s32.totalorder %s734_s1, %s734_s1 }
  0x12   :  { %804 = vmatmul.mubr.msk.f32.vlgmr.msra.gmra.mxu0 %vm38_vm0, %v1028_v9  ;;  %818 = vmatprep.subr.bf16.mxu0 %v936_v10  ;;  %p915_p0 = scmp.ne.s32.totalorder %s734_s1, %s914_s24  ;;  %p920_p2 = scmp.lt.s32.totalorder %s914_s24, %s914_s24 }
  0x13   :  { %820 = vmatprep.mubr.msk.bf16.mxu0 %vm937_vm1, %v936_v10 }
  0x14   :  { %p921_p3 = por %p920_p2, %p919_p1 }
  0x16   :  { %p922_p4 = pnand %p921_p3, %p915_p0 }
  0xd2   :  { %v805_v14 = vpop.f32.mrf.mxu0 }
  0xd3   :  { %v127_v18 = vmul.f32 %v805_v14, %v125_v13 }
  0xd4   :  { %v111_v19 = vpop.f32.mrf.mxu0 }
  0xd5   :  { %v126_v20 = vmul.f32 %v124_v15, %v111_v19  ;;  %v129_v21 = vadd.f32 %v127_v18, %v123_v17 }
  0xd7   :  { %v128_v22 = vadd.f32 %v126_v20, %v122_v16 }
  0xd9   :  { %v130_v23 = vpack.c.bf16 %v129_v21, %v128_v22 }
  0xdb   :  { %259 = vrot.lane.b32.xlu1 %v130_v23, %s938_s2  ;;  %135 = vrot.lane.b32.xlu0 %v130_v23, %s939_s3 }
  0xdf   :  { %393 = vrot.lane.b32.xlu1 %v130_v23, %s940_s27  ;;  %261 = vrot.lane.b32.xlu0 %v130_v23, %s941_s28 }
  0xe3   :  { %525 = vrot.lane.b32.xlu1 %v130_v23, %s942_s29  ;;  %391 = vrot.lane.b32.xlu0 %v130_v23, %s943_s30 }
  0xe7   :  { %523 = vrot.lane.b32.xlu0 %v130_v23, %s944_s8 }
 0x14d   :  { %v136_v24 = vpop.permute.xlu0 %135  ;;  %v260_v26 = vpop.permute.xlu1 %259 }
 0x14e   :  { %v142_v25 = vsel %vm137_vm2, %v136_v24, 0 }
 0x14f   :  { %807 = vmatpush3.bf16.xpose.msra.mxu1 %v142_v25 }
 0x150   :  { %812 = vmatprep.subr.bf16.mxu1 %v936_v10 }
 0x151   :  { %v262_v27 = vpop.permute.xlu0 %261  ;;  %v394_v29 = vpop.permute.xlu1 %393 }
 0x152   :  { %v267_v28 = vsel %vm137_vm2, %v262_v27, 0  ;;  %v399_v30 = vsel %vm137_vm2, %v394_v29, 0 }
 0x153   :  { %819 = vmatpush3.bf16.xpose.msra.mxu0 %v267_v28 }
 0x154   :  { %830 = vmatprep.subr.bf16.mxu0 %v936_v10 }
 0x155   :  { %v526_v31 = vpop.permute.xlu1 %525  ;;  %v392_v32 = vpop.permute.xlu0 %391 }
 0x156   :  { %809 = vmatmul.mubr.msk.bf16.vlgmr.msra.gmra.mxu1 %vm137_vm2, %v130_v23  ;;  %v531_v33 = vsel %vm137_vm2, %v526_v31, 0 }
 0x157   :  { %814 = vmatprep.mubr.msk.bf16.mxu1 %vm937_vm1, %v936_v10 }
 0x159   :  { %v524_v34 = vpop.permute.xlu0 %523 }
 0x15a   :  { %821 = vmatmul.mubr.msk.bf16.vlgmr.msra.gmra.mxu0 %vm137_vm2, %v260_v26 }
 0x15b   :  { %831 = vmatpush3.bf16.xpose.msra.mxu0 %v399_v30  ;;  %832 = vmatprep.mubr.msk.bf16.mxu0 %vm937_vm1, %v936_v10 }
 0x15c   :  { %842 = vmatprep.subr.bf16.mxu0 %v936_v10 }
 0x162   :  { %833 = vmatmul.mubr.msk.bf16.vlgmr.msra.gmra.mxu0 %vm137_vm2, %v392_v32 }
 0x163   :  { %843 = vmatpush3.bf16.xpose.msra.mxu0 %v531_v33  ;;  %844 = vmatprep.mubr.msk.bf16.mxu0 %vm937_vm1, %v936_v10 }
 0x164   :  { %854 = vmatprep.subr.bf16.mxu0 %v936_v10 }
 0x16a   :  { %845 = vmatmul.mubr.msk.bf16.vlgmr.msra.gmra.mxu0 %vm137_vm2, %v524_v34 }
 0x16b   :  { %858 = vmatprep.mubr.msk.bf16.mxu0 %vm937_vm1, %v936_v10 }
 0x216   :  { %v178_v36 = vpop.f32.mrf.mxu1 }
 0x217   :  { %v179_v37 = vadd.f32 %v178_v36, %v131_v35 }
 0x218   :  { %v810_v38 = vpop.f32.mrf.mxu1 }
 0x219   :  { %v186_v39 = vsel %vm185_vm3, %v179_v37, -inf }
 0x21a   :  { %187 = vmax.xlane.f32.xlu1 %v186_v39  ;;  %v181_v41 = vpop.f32.mrf.mxu1  ;;  %v303_v42 = vpop.f32.mrf.mxu0 }
 0x21b   :  { %v304_v43 = vadd.f32 %v303_v42, %v131_v35  ;;  %v182_v46 = vadd.f32 %v181_v41, %v132_v40 }
 0x21c   :  { %v811_v44 = vpop.f32.mrf.mxu1  ;;  %v822_v45 = vpop.f32.mrf.mxu0 }
 0x21d   :  { %v310_v47 = vsel %vm185_vm3, %v304_v43, -inf  ;;  %v189_v51 = vsel %vm185_vm3, %v182_v46, -inf }
 0x21e   :  { %311 = vmax.xlane.f32.xlu0 %v310_v47  ;;  %v306_v48 = vpop.f32.mrf.mxu0 }
 0x21f   :  { %v307_v49 = vadd.f32 %v306_v48, %v132_v40 }
 0x220   :  { %v823_v50 = vpop.f32.mrf.mxu0 }
 0x221   :  { %v313_v52 = vsel %vm185_vm3, %v307_v49, -inf }
 0x222   :  { %190 = vmax.xlane.f32.xlu0 %v189_v51  ;;  %314 = vmax.xlane.f32.xlu1 %v313_v52  ;;  %v435_v53 = vpop.f32.mrf.mxu0 }
 0x223   :  { %v436_v54 = vadd.f32 %v435_v53, %v131_v35 }
 0x224   :  { %v834_v55 = vpop.f32.mrf.mxu0 }
 0x225   :  { %v442_v56 = vsel %vm185_vm3, %v436_v54, -inf }
 0x226   :  { %443 = vmax.xlane.f32.xlu0 %v442_v56  ;;  %v438_v57 = vpop.f32.mrf.mxu0 }
 0x227   :  { %v439_v0 = vadd.f32 %v438_v57, %v132_v40 }
 0x228   :  { %v835_v58 = vpop.f32.mrf.mxu0 }
 0x229   :  { %v445_v4 = vsel %vm185_vm3, %v439_v0, -inf }
 0x22a   :  { %v567_v59 = vpop.f32.mrf.mxu0 }
 0x22b   :  { %v1085_v1 = vadd.f32 %v567_v59, %v131_v35 }
 0x22c   :  { %v846_v60 = vpop.f32.mrf.mxu0 }
 0x22d   :  { %v574_v5 = vsel %vm185_vm3, %v1085_v1, -inf }
 0x22e   :  { %v570_v61 = vpop.f32.mrf.mxu0 }
 0x22f   :  { %v571_v2 = vadd.f32 %v570_v61, %v132_v40 }
 0x230   :  { %v847_v63 = vpop.f32.mrf.mxu0 }
 0x231   :  { %v577_v6 = vsel %vm185_vm3, %v571_v2, -inf }
 0x233   :  { %329 = vrot.lane.b32.xlu1 %v133_v62, %s945_s0 }
 0x23c   :  { %206 = vrot.lane.b32.xlu0 %v133_v62, %s946_s13 }
 0x257   :  { %446 = vmax.xlane.f32.xlu1 %v445_v4 }
 0x25b   :  { %575 = vmax.xlane.f32.xlu0 %v574_v5  ;;  %578 = vmax.xlane.f32.xlu1 %v577_v6 }
 0x26c   :  { %461 = vrot.lane.b32.xlu1 %v133_v62, %s947_s14 }
 0x271   :  { %593 = vrot.lane.b32.xlu0 %v133_v62, %s948_s15 }
 0x2a3   :  { %v188_v3 = vpop.xlane.xlu1 %187 }
 0x2a4   :  { %v192_v7 = vsub.f32 %v179_v37, %v188_v3 }
 0x2a6   :  { %v194_v12 = vmul.f32 1.442695, %v192_v7 }
 0x2a7   :  { %v312_v8 = vpop.xlane.xlu0 %311 }
 0x2a8   :  { %v316_v9 = vsub.f32 %v304_v43, %v312_v8 }
 0x2aa   :  { %v318_v11 = vmul.f32 1.442695, %v316_v9 }
 0x2ab   :  { %v315_v13 = vpop.xlane.xlu1 %314  ;;  %v191_v14 = vpop.xlane.xlu0 %190 }
 0x2ac   :  { %882 = vpow2.f32 %v318_v11  ;;  %v317_v15 = vsub.f32 %v307_v49, %v315_v13  ;;  %v193_v16 = vsub.f32 %v182_v46, %v191_v14 }
 0x2ad   :  { %884 = vpow2.f32 %v194_v12 }
 0x2ae   :  { %v320_v17 = vmul.f32 1.442695, %v317_v15  ;;  %v196_v18 = vmul.f32 1.442695, %v193_v16 }
 0x2af   :  { %v444_v19 = vpop.xlane.xlu0 %443  ;;  %v330_v31 = vpop.permute.xlu1 %329 }
 0x2b0   :  { %886 = vpow2.f32 %v320_v17  ;;  %v448_v20 = vsub.f32 %v436_v54, %v444_v19 }
 0x2b1   :  { %888 = vpow2.f32 %v196_v18 }
 0x2b2   :  { %v450_v21 = vmul.f32 1.442695, %v448_v20  ;;  %v880_v20 = vld [vmem:[%s1136_s5 + $0x8] sm:$0xff]  }
 0x2b3   :  { %v207_v22 = vpop.permute.xlu0 %206  ;;  %855 = vmatpush3.bf16.msra.mxu0 %v880_v20 }
 0x2b4   :  { %890 = vpow2.f32 %v450_v21  ;;  %813 = vmatpush3.bf16.msra.mxu1 %v207_v22  ;;  %856 = vmatprep.subr.bf16.mxu0 %v936_v10 }
 0x2b5   :  { %824 = vmatprep.subr.bf16.mxu1 %v936_v10 }
 0x2b9   :  { %v883_v23 = vpop.eup %882 }
 0x2ba   :  { %v322_v24 = vsel %vm185_vm3, %v883_v23, 0.0  ;;  %v885_v25 = vpop.eup %884 }
 0x2bb   :  { %323 = vadd.xlane.f32.xlu1 %v322_v24  ;;  %v198_v54 = vsel %vm185_vm3, %v885_v25, 0.0 }
 0x2bd   :  { %v887_v26 = vpop.eup %886 }
 0x2be   :  { %v889_v27 = vpop.eup %888  ;;  %v325_v28 = vsel %vm185_vm3, %v887_v26, 0.0  ;;  %v328_v33 = vpack.c.bf16 %v887_v26, %v883_v23  ;;  %v881_v23 = vld [vmem:[%s1136_s5] sm:$0xff]  }
 0x2bf   :  { %326 = vadd.xlane.f32.xlu0 %v325_v28  ;;  %v204_v29 = vpack.c.bf16 %v889_v27, %v885_v25  ;;  %v201_v52 = vsel %vm185_vm3, %v889_v27, 0.0  ;;  %857 = vmatpush3.bf16.msra.mxu0 %v881_v23 }
 0x2c1   :  { %v891_v30 = vpop.eup %890  ;;  %815 = vmatmul.mubr.msk.bf16.vlgmr.msra.gmra.mxu1 %vm185_vm3, %v204_v29 }
 0x2c2   :  { %825 = vmatpush3.bf16.msra.mxu1 %v330_v31  ;;  %v454_v32 = vsel %vm185_vm3, %v891_v30, 0.0  ;;  %826 = vmatprep.mubr.msk.bf16.mxu1 %vm937_vm1, %v936_v10 }
 0x2c3   :  { %455 = vadd.xlane.f32.xlu0 %v454_v32  ;;  %836 = vmatprep.subr.bf16.mxu1 %v936_v10 }
 0x2c9   :  { %827 = vmatmul.mubr.msk.bf16.vlgmr.msra.gmra.mxu1 %vm185_vm3, %v328_v33 }
 0x2ca   :  { %838 = vmatprep.mubr.msk.bf16.mxu1 %vm937_vm1, %v936_v10 }
 0x2e0   :  { %v447_v34 = vpop.xlane.xlu1 %446 }
 0x2e1   :  { %v449_v35 = vsub.f32 %v439_v0, %v447_v34 }
 0x2e3   :  { %v452_v36 = vmul.f32 1.442695, %v449_v35 }
 0x2e4   :  { %v579_v37 = vpop.xlane.xlu1 %578  ;;  %v576_v38 = vpop.xlane.xlu0 %575 }
 0x2e5   :  { %892 = vpow2.f32 %v452_v36  ;;  %v581_v39 = vsub.f32 %v571_v2, %v579_v37  ;;  %v580_v40 = vsub.f32 %v1085_v1, %v576_v38 }
 0x2e7   :  { %v584_v41 = vmul.f32 1.442695, %v581_v39  ;;  %v582_v42 = vmul.f32 1.442695, %v580_v40 }
 0x2e8   :  { %v462_v43 = vpop.permute.xlu1 %461  ;;  %v594_v46 = vpop.permute.xlu0 %593 }
 0x2e9   :  { %894 = vpow2.f32 %v584_v41  ;;  %837 = vmatpush3.bf16.msra.mxu1 %v462_v43 }
 0x2ea   :  { %896 = vpow2.f32 %v582_v42  ;;  %848 = vmatprep.subr.bf16.mxu1 %v936_v10  ;;  %v754_v42 = vld [vmem:[%s1137_s6] ss:$0 sm:$0xff] }
 0x2f2   :  { %v893_v44 = vpop.eup %892 }
 0x2f3   :  { %v457_v45 = vsel %vm185_vm3, %v893_v44, 0.0  ;;  %v460_v47 = vpack.c.bf16 %v893_v44, %v891_v30 }
 0x2f4   :  { %458 = vadd.xlane.f32.xlu1 %v457_v45 }
 0x2f5   :  { %839 = vmatmul.mubr.msk.bf16.vlgmr.msra.gmra.mxu1 %vm185_vm3, %v460_v47 }
 0x2f6   :  { %v895_v48 = vpop.eup %894  ;;  %849 = vmatpush3.bf16.msra.mxu1 %v594_v46  ;;  %850 = vmatprep.mubr.msk.bf16.mxu1 %vm937_vm1, %v936_v10 }
 0x2f7   :  { %v897_v49 = vpop.eup %896  ;;  %v589_v50 = vsel %vm185_vm3, %v895_v48, 0.0 }
 0x2f8   :  { %590 = vadd.xlane.f32.xlu1 %v589_v50  ;;  %v586_v51 = vsel %vm185_vm3, %v897_v49, 0.0  ;;  %v592_v53 = vpack.c.bf16 %v895_v48, %v897_v49 }
 0x2f9   :  { %587 = vadd.xlane.f32.xlu0 %v586_v51 }
 0x2fc   :  { %202 = vadd.xlane.f32.xlu1 %v201_v52 }
 0x2fd   :  { %199 = vadd.xlane.f32.xlu0 %v198_v54  ;;  %851 = vmatmul.mubr.msk.bf16.vlgmr.msra.gmra.mxu1 %vm185_vm3, %v592_v53 }
 0x344   :  { %v324_v56 = vpop.xlane.xlu1 %323 }
 0x345   :  { %898 = vrcp.f32 %v324_v56 }
 0x348   :  { %v327_v55 = vpop.xlane.xlu0 %326 }
 0x349   :  { %900 = vrcp.f32 %v327_v55 }
 0x34c   :  { %v456_v58 = vpop.xlane.xlu0 %455 }
 0x352   :  { %v899_v4 = vpop.eup %898 }
 0x356   :  { %v901_v7 = vpop.eup %900 }
 0x37d   :  { %v459_v57 = vpop.xlane.xlu1 %458 }
 0x381   :  { %v246_v59 = vpop.f32.mrf.mxu1  ;;  %v591_v60 = vpop.xlane.xlu1 %590 }
 0x382   :  { %v588_v61 = vpop.xlane.xlu0 %587 }
 0x383   :  { %v816_v62 = vpop.f32.mrf.mxu1 }
 0x385   :  { %v249_v63 = vpop.f32.mrf.mxu1  ;;  %v203_v0 = vpop.xlane.xlu1 %202 }
 0x386   :  { %902 = vrcp.f32 %v203_v0  ;;  %v200_v1 = vpop.xlane.xlu0 %199 }
 0x387   :  { %904 = vrcp.f32 %v200_v1  ;;  %v817_v2 = vpop.f32.mrf.mxu1 }
 0x388   :  { %906 = vrcp.f32 %v456_v58 }
 0x389   :  { %v369_v5 = vpop.f32.mrf.mxu1  ;;  %908 = vrcp.f32 %v459_v57 }
 0x38a   :  { %v377_v6 = vmul.f32 %v899_v4, %v369_v5  ;;  %910 = vrcp.f32 %v588_v61 }
 0x38b   :  { %v828_v3 = vpop.f32.mrf.mxu1  ;;  %912 = vrcp.f32 %v591_v60 }
 0x38c   :  { %382 = vrot.lane.b32.xlu0 %v377_v6, %s949_s16 }
 0x38d   :  { %v372_v8 = vpop.f32.mrf.mxu1 }
 0x38e   :  { %v379_v9 = vmul.f32 %v901_v7, %v372_v8 }
 0x38f   :  { %v829_v11 = vpop.f32.mrf.mxu1 }
 0x390   :  { %384 = vrot.lane.b32.xlu1 %v379_v9, %s949_s16 }
 0x393   :  { %v903_v12 = vpop.eup %902 }
 0x394   :  { %v905_v13 = vpop.eup %904  ;;  %v256_v14 = vmul.f32 %v903_v12, %v249_v63 }
 0x395   :  { %v254_v15 = vmul.f32 %v905_v13, %v246_v59  ;;  %v907_v16 = vpop.eup %906 }
 0x396   :  { %258 = vst.msk [vmem:[#allocation2 + $0x8] sm:$0xff] %vm137_vm2, %v256_v14  ;;  %v909_v21 = vpop.eup %908 }
 0x397   :  { %257 = vst.msk [vmem:[#allocation2] sm:$0xff] %vm137_vm2, %v254_v15  ;;  %v911_v26 = vpop.eup %910 }
 0x398   :  { %v913_v30 = vpop.eup %912 }
 0x3b5   :  { %v501_v17 = vpop.f32.mrf.mxu1 }
 0x3b6   :  { %v509_v18 = vmul.f32 %v907_v16, %v501_v17 }
 0x3b7   :  { %v840_v19 = vpop.f32.mrf.mxu1 }
 0x3b8   :  { %514 = vrot.lane.b32.xlu1 %v509_v18, %s950_s19 }
 0x3b9   :  { %v504_v22 = vpop.f32.mrf.mxu1 }
 0x3ba   :  { %v511_v24 = vmul.f32 %v909_v21, %v504_v22 }
 0x3bb   :  { %v841_v25 = vpop.f32.mrf.mxu1 }
 0x3bc   :  { %516 = vrot.lane.b32.xlu0 %v511_v24, %s950_s19 }
 0x3bd   :  { %v633_v27 = vpop.f32.mrf.mxu1 }
 0x3be   :  { %v641_v28 = vmul.f32 %v911_v26, %v633_v27 }
 0x3bf   :  { %v852_v29 = vpop.f32.mrf.mxu1 }
 0x3c0   :  { %646 = vrot.lane.b32.xlu1 %v641_v28, %s951_s22 }
 0x3c1   :  { %v636_v31 = vpop.f32.mrf.mxu1 }
 0x3c2   :  { %v643_v32 = vmul.f32 %v913_v30, %v636_v31 }
 0x3c3   :  { %v853_v33 = vpop.f32.mrf.mxu1 }
 0x3c4   :  { %648 = vrot.lane.b32.xlu0 %v643_v32, %s951_s22 }
 0x3fe   :  { %v383_v34 = vpop.permute.xlu0 %382 }
 0x3ff   :  { %389 = vst.msk [vmem:[#allocation2] sm:$0xff] %vm388_vm4, %v383_v34 }
 0x402   :  { %v385_v35 = vpop.permute.xlu1 %384 }
 0x403   :  { %390 = vst.msk [vmem:[#allocation2 + $0x8] sm:$0xff] %vm388_vm4, %v385_v35 }
 0x42a   :  { %v515_v10 = vpop.permute.xlu1 %514 }
 0x42b   :  { %521 = vst.msk [vmem:[#allocation2] sm:$0xff] %vm520_vm5, %v515_v10 }
 0x42e   :  { %v517_v36 = vpop.permute.xlu0 %516 }
 0x42f   :  { %522 = vst.msk [vmem:[#allocation2 + $0x8] sm:$0xff] %vm520_vm5, %v517_v36 }
 0x432   :  { %v647_v37 = vpop.permute.xlu1 %646 }
 0x433   :  { %653 = vst.msk [vmem:[#allocation2] sm:$0xff] %vm652_vm6, %v647_v37 }
 0x436   :  { %v649_v38 = vpop.permute.xlu0 %648 }
 0x437   :  { %654 = vst.msk [vmem:[#allocation2 + $0x8] sm:$0xff] %vm652_vm6, %v649_v38 }
 0x43a   :  { %v655_v39 = vld [vmem:[#allocation2] sm:$0xff] }
 0x43e   :  { %v656_v40 = vld [vmem:[#allocation2 + $0x8] sm:$0xff] }
 0x43f   :  { %v657_v41 = vpack.c.bf16 %v656_v40, %v655_v39 }
 0x441   :  { %859 = vmatmul.mubr.msk.bf16.vlgmr.msra.gmra.mxu0 %vm681_vm7, %v657_v41 }
 0x501   :  { %v719_v43 = vpop.f32.mrf.mxu0 }
 0x502   :  { %v720_v44 = vadd.f32 %v754_v42, %v719_v43 }
 0x503   :  { %v860_v45 = vpop.f32.mrf.mxu0 }
 0x504   :  { %726 = vst.msk [vmem:[#allocation3] sm:$0xff] %vm681_vm7, %v720_v44 }
 0x505   :  { %v722_v46 = vpop.f32.mrf.mxu0 }
 0x506   :  { %v723_v47 = vadd.f32 %v754_v42, %v722_v46 }
 0x507   :  { %v861_v48 = vpop.f32.mrf.mxu0 }
 0x508   :  { %727 = vst.msk [vmem:[#allocation3 + $0x8] sm:$0xff] %vm681_vm7, %v723_v47 }
 0x509   :  { %925 = shalt.err (!%p922_p4)
}
 0x50a   :  { %s953_s25 = smov 128  }
 0x50b   :  { %739 = dma.vmem_to_hbm [thread:$0]  %s734_s1, 256, %s1138_s7, [#allocation4], %s953_s25, %s953_s25, %s949_s16  }
 0x50c   :  { %934 = dma.done.wait [#allocation4], 256  }
 0x50d   :  { %935 = vsyncadd [#allocation4], 4294967040 }
 0x50e   :  { %743 = vsyncpa [#allocation4], 1 }

</bundles_post_ra>
